<compile_context>
chip_gen: v6e
topology: v6e:2x2x1
jax: 0.10.0
libtpu: 0.0.40
codegen_flags: <defaults>
</compile_context>

<pallas_src>
import math
import functools

import jax
import jax.numpy as jnp
import numpy as np
from jax import lax
from jax.experimental import pallas as pl
from jax.experimental.pallas import tpu as pltpu


# ----------------------------------------------------------------------------
# Activations (JAX equivalents of the torch table). Evaluated in f32.
# ----------------------------------------------------------------------------
_SQRT_2_OVER_PI = math.sqrt(2.0 / math.pi)

_ACTIVATIONS = {
    'linear': lambda x: x,
    'relu': lambda x: jnp.maximum(x, 0.0),
    'relu6': lambda x: jnp.clip(x, 0.0, 6.0),
    'gelu': lambda x: 0.5 * x * (1.0 + lax.erf(x * (1.0 / math.sqrt(2.0)))),
    'gelu_python': lambda x: 0.5 * x * (1.0 + lax.erf(x * (1.0 / math.sqrt(2.0)))),
    'gelu_new': lambda x: 0.5 * x * (
        1.0 + jnp.tanh(_SQRT_2_OVER_PI * (x + 0.044715 * x * x * x))),
    'gelu_pytorch_tanh': lambda x: 0.5 * x * (
        1.0 + jnp.tanh(_SQRT_2_OVER_PI * (x + 0.044715 * x * x * x))),
    'gelu_fast': lambda x: 0.5 * x * (
        1.0 + jnp.tanh(x * 0.7978845608 * (1.0 + 0.044715 * x * x))),
    'quick_gelu': lambda x: x * jax.nn.sigmoid(1.702 * x),
    'sigmoid': jax.nn.sigmoid,
    'silu': jax.nn.silu,
    'swish': jax.nn.silu,
    'tanh': jnp.tanh,
    # TODO(synk): 'prelu' requires a learned slope parameter (torch.nn.PReLU); not ported.
}

_NO_TRANSCENDENTAL = ('linear', 'relu', 'relu6')


# ----------------------------------------------------------------------------
# Small helpers
# ----------------------------------------------------------------------------
def _round_up(n, m):
    return (n + m - 1) // m * m


def _pad_to(a, shape):
    return jnp.pad(a, [(0, t - s) for t, s in zip(shape, a.shape)])


def _vmem_limit_bytes():
    cap = 128 * 1024 * 1024
    try:
        info = pltpu.get_tpu_info()
        cap = int(getattr(info, 'vmem_capacity_bytes', cap) or cap)
    except Exception:
        pass
    # Leave headroom for semaphores / internal scratch; never request the whole
    # part (v7x only has 64 MiB physical).  -> ~52 MiB on v7x, ~110 MiB v5e/v6e.
    return int(min(max(cap - 12 * 1024 * 1024, 32 * 1024 * 1024),
                   110 * 1024 * 1024))


# ----------------------------------------------------------------------------
# One-time parameter preparation (hoisted out of the forward path)
# ----------------------------------------------------------------------------
def prepare_ffn_params(params, *, ff_is_gated, ff_chunk=512,
                       mxu_dtype=jnp.bfloat16):
    """Transpose torch-layout Linear weights ([out,in] -> [in,out]), zero-pad
    model_dim / ff_dim to lane multiples (128), interleave wi_0|wi_1 per
    ff-chunk (one fused MXU call + 128-aligned split per chunk), and cast to
    the MXU operand dtype.

    Call ONCE at parameter-load time and cache the result; calling per forward
    would add a weight-sized HBM round trip to every step.
    Set mxu_dtype=jnp.float32 for exact-parity tests (slower on the MXU).
    """
    wo = jnp.asarray(params['wo'])                    # torch layout [D, F]
    d_model, ff_dim = wo.shape
    d_pad = _round_up(d_model, 128)

    f_chunk = _round_up(min(ff_chunk, _round_up(ff_dim, 128)), 128)
    f_pad = _round_up(_round_up(ff_dim, 128), f_chunk)
    n_chunks = f_pad // f_chunk

    ln_w = _pad_to(jnp.asarray(params['ln_w']).astype(jnp.float32)
                   .reshape(1, d_model), (1, d_pad))

    wo_t = _pad_to(wo.T.astype(mxu_dtype), (f_pad, d_pad))        # [Fp, Dp]

    if ff_is_gated:
        wi0 = _pad_to(jnp.asarray(params['wi_0']).T.astype(mxu_dtype),
                      (d_pad, f_pad))                              # [Dp, Fp]
        wi1 = _pad_to(jnp.asarray(params['wi_1']).T.astype(mxu_dtype),
                      (d_pad, f_pad))
        # Chunk-interleave: block j holds [wi_0 chunk j | wi_1 chunk j] so the
        # kernel issues one fused matmul per chunk and splits at f_chunk
        # (a multiple of 128 -> free, tile-aligned slice).
        wi_t = jnp.concatenate(
            [wi0.reshape(d_pad, n_chunks, f_chunk),
             wi1.reshape(d_pad, n_chunks, f_chunk)],
            axis=-1).reshape(d_pad, 2 * f_pad)
    else:
        wi_t = _pad_to(jnp.asarray(params['wi']).T.astype(mxu_dtype),
                       (d_pad, f_pad))

    return dict(ln_w=ln_w, wi_t=wi_t, wo_t=wo_t,
                d_model=d_model, ff_dim=ff_dim, d_pad=d_pad, f_pad=f_pad,
                f_chunk=f_chunk, n_chunks=n_chunks,
                is_gated=ff_is_gated, mxu_dtype=mxu_dtype)


# ----------------------------------------------------------------------------
# Pallas kernel: RMSNorm (once per token tile) + (gated) FFN chunk + residual
# ----------------------------------------------------------------------------
def _ffn_kernel(x_ref, lnw_ref, wi_ref, wo_ref, o_ref, xn_ref, acc_ref, *,
                eps, act_name, f_chunk, is_gated, inv_d, mxu_dtype):
    j = pl.program_id(1)            # ff-chunk index (reduction axis, last)

    # First ff-chunk of this token tile: RMSNorm once (cached for all chunks)
    # and zero the output-projection accumulator.
    @pl.when(j == 0)
    def _():
        x = x_ref[...].astype(jnp.float32)
        # Padded feature columns are zero, so sum(x*x) * (1/true_D) equals the
        # unpadded mean -> identical RMSNorm.
        var = jnp.sum(x * x, axis=-1, keepdims=True) * inv_d
        xn = (x * lax.rsqrt(var + eps)) * lnw_ref[...]
        xn_ref[...] = xn.astype(mxu_dtype)
        acc_ref[...] = jnp.zeros_like(acc_ref)

    # Input projection for this ff-chunk: one MXU call (bf16 in, f32 acc).
    h = jnp.dot(xn_ref[...], wi_ref[...], preferred_element_type=jnp.float32)

    act = _ACTIVATIONS[act_name]
    if is_gated:
        # 128-aligned split of the fused [wi_0 | wi_1] chunk.
        h = act(h[:, :f_chunk]) * h[:, f_chunk:]
    else:
        h = act(h)
    # Dropout: inference no-op.

    # Output projection, accumulated in f32 across ff-chunks.
    acc_ref[...] += jnp.dot(h.astype(mxu_dtype), wo_ref[...],
                            preferred_element_type=jnp.float32)

    # Last ff-chunk: add the residual and emit in the activation dtype.
    @pl.when(j == pl.num_programs(1) - 1)
    def _():
        o_ref[...] = (acc_ref[...] + x_ref[...].astype(jnp.float32)
                      ).astype(o_ref.dtype)


# ----------------------------------------------------------------------------
# Forward wrapper (no weight-sized work; layout plumbing already done in prep)
# ----------------------------------------------------------------------------
def feed_forward_layer(x, prepared, *, ff_activation_fn, layer_norm_epsilon,
                       token_tile=512):
    """x: [B, S, D] (f32 or bf16). `prepared` comes from prepare_ffn_params."""
    B, S, d_model = x.shape
    assert d_model == prepared['d_model']
    N = B * S

    d_pad = prepared['d_pad']
    f_pad = prepared['f_pad']
    f_chunk = prepared['f_chunk']
    n_chunks = prepared['n_chunks']
    is_gated = prepared['is_gated']
    mxu_dtype = prepared['mxu_dtype']
    ln_w, wi_t, wo_t = prepared['ln_w'], prepared['wi_t'], prepared['wo_t']

    # Token tile: multiple of the dtype sublane count, and small enough that
    # the token grid has >=2 steps (so both v7x TensorCores get work).
    sub = 16 if x.dtype == jnp.bfloat16 else 8
    tile = max(sub, min(token_tile, _round_up(max(N // 2, 1), sub)))
    n_token_tiles = pl.cdiv(N, tile)     # boundary block masked by Pallas

    x_flat = x.reshape(N, d_model)
    if d_pad != d_model:
        # Only for lane-unaligned model dims (toy configs); real model dims
        # (multiples of 128) take the no-copy path.
        x_flat = jnp.pad(x_flat, ((0, 0), (0, d_pad - d_model)))

    wi_cols = 2 * f_chunk if is_gated else f_chunk

    kernel = functools.partial(
        _ffn_kernel, eps=layer_norm_epsilon, act_name=ff_activation_fn,
        f_chunk=f_chunk, is_gated=is_gated, inv_d=1.0 / d_model,
        mxu_dtype=mxu_dtype)

    flops_per_tok = (6 if is_gated else 4) * d_pad * f_pad + 4 * d_pad
    transcendentals = (0 if ff_activation_fn in _NO_TRANSCENDENTAL
                       else N * f_pad)
    bytes_accessed = (2 * N * d_pad * x.dtype.itemsize
                      + ln_w.nbytes + wi_t.nbytes + wo_t.nbytes)
    cost = pl.CostEstimate(flops=int(N) * int(flops_per_tok),
                           transcendentals=int(transcendentals),
                           bytes_accessed=int(bytes_accessed))

    out_flat = pl.pallas_call(
        kernel,
        out_shape=jax.ShapeDtypeStruct((N, d_pad), x.dtype),
        grid_spec=pltpu.PrefetchScalarGridSpec(
            num_scalar_prefetch=0,
            grid=(n_token_tiles, n_chunks),
            in_specs=[
                pl.BlockSpec((tile, d_pad), lambda i, j: (i, 0)),     # x tile
                pl.BlockSpec((1, d_pad), lambda i, j: (0, 0)),        # RMSNorm w
                pl.BlockSpec((d_pad, wi_cols), lambda i, j: (0, j)),  # W_in chunk
                pl.BlockSpec((f_chunk, d_pad), lambda i, j: (j, 0)),  # W_out chunk
            ],
            out_specs=pl.BlockSpec((tile, d_pad), lambda i, j: (i, 0)),
            scratch_shapes=[
                pltpu.VMEM((tile, d_pad), mxu_dtype),    # cached RMSNorm(x)
                pltpu.VMEM((tile, d_pad), jnp.float32),  # out-proj accumulator
            ],
        ),
        compiler_params=pltpu.CompilerParams(
            dimension_semantics=("parallel", "arbitrary"),
            vmem_limit_bytes=_vmem_limit_bytes()),
        cost_estimate=cost,
    )(x_flat, ln_w, wi_t, wo_t)

    if d_pad != d_model:
        out_flat = out_flat[:, :d_model]
    return out_flat.reshape(B, S, d_model)


# ----------------------------------------------------------------------------
# Pure-JAX reference (f32, matches the torch module's forward)
# ----------------------------------------------------------------------------
def reference(x, params, *, ff_activation_fn, ff_is_gated, layer_norm_epsilon):
    residual = x
    var = jnp.mean(x * x, axis=-1, keepdims=True)
    xn = params['ln_w'] * (x * lax.rsqrt(var + layer_norm_epsilon))
    act = _ACTIVATIONS[ff_activation_fn]
    if ff_is_gated:
        gate = xn @ params['wi_1'].T
        h = act(xn @ params['wi_0'].T) * gate
    else:
        h = act(xn @ params['wi'].T)
    return h @ params['wo'].T + residual


# ----------------------------------------------------------------------------
if __name__ == "__main__":
    B, S = 2, 8
    model_dim = 32
    ff_dim = 64
    eps = 1e-6
    dtype = jnp.float32

    key = jax.random.PRNGKey(0)
    k_x, k_0, k_1, k_o, k_ln, k_w = jax.random.split(key, 6)

    x = jax.random.normal(k_x, (B, S, model_dim), dtype=dtype)

    # --- gated variant (T5 v1.1 style, gelu_new) ---
    params_gated = {
        'ln_w': jax.random.normal(k_ln, (model_dim,), dtype=dtype) * 0.1 + 1.0,
        'wi_0': jax.random.normal(k_0, (ff_dim, model_dim), dtype=dtype) * 0.1,
        'wi_1': jax.random.normal(k_1, (ff_dim, model_dim), dtype=dtype) * 0.1,
        'wo': jax.random.normal(k_o, (model_dim, ff_dim), dtype=dtype) * 0.1,
    }
    prep_g = prepare_ffn_params(params_gated, ff_is_gated=True)   # one-time prep
    out_g = feed_forward_layer(x, prep_g, ff_activation_fn='gelu_new',
                               layer_norm_epsilon=eps)
    out_g = jax.block_until_ready(out_g)
    ref_g = reference(x, params_gated, ff_activation_fn='gelu_new',
                      ff_is_gated=True, layer_norm_epsilon=eps)
    np.testing.assert_allclose(np.asarray(out_g), np.asarray(ref_g),
                               rtol=2e-2, atol=1e-2)

    # --- ungated variant (classic T5, relu) ---
    params_plain = {
        'ln_w': params_gated['ln_w'],
        'wi': jax.random.normal(k_w, (ff_dim, model_dim), dtype=dtype) * 0.1,
        'wo': params_gated['wo'],
    }
    prep_p = prepare_ffn_params(params_plain, ff_is_gated=False)  # one-time prep
    out_p = feed_forward_layer(x, prep_p, ff_activation_fn='relu',
                               layer_norm_epsilon=eps)
    out_p = jax.block_until_ready(out_p)
    ref_p = reference(x, params_plain, ff_activation_fn='relu',
                      ff_is_gated=False, layer_norm_epsilon=eps)
    np.testing.assert_allclose(np.asarray(out_p), np.asarray(ref_p),
                               rtol=2e-2, atol=1e-2)

    print("KERNEL_OK")
</pallas_src>

<mosaic_0001>
module attributes {stable_mosaic.version = 11 : i64} {
  func.func @_ffn_kernel(%arg0: i32, %arg1: i32, %arg2: memref<8x128xf32, #tpu.memory_space<vmem>>, %arg3: memref<1x128xf32, #tpu.memory_space<vmem>>, %arg4: memref<128x256xbf16, #tpu.memory_space<vmem>>, %arg5: memref<128x128xbf16, #tpu.memory_space<vmem>>, %arg6: memref<8x128xf32, #tpu.memory_space<vmem>>, %arg7: memref<8x128xbf16, #tpu.memory_space<vmem>>, %arg8: memref<8x128xf32, #tpu.memory_space<vmem>>) attributes {dimension_semantics = [#tpu.dimension_semantics<parallel>, #tpu.dimension_semantics<arbitrary>], iteration_bounds = array<i64: 2, 1>, scalar_prefetch = 0 : i64, scratch_operands = 2 : i64, tpu.core_type = #tpu.core_type<tc>, window_params = [{transform_indices = @transform_0, window_bounds = array<i64: 8, 128>}, {pipeline_mode = #tpu.pipeline_mode<synchronous>, transform_indices = @transform_1, window_bounds = array<i64: 1, 128>}, {transform_indices = @transform_2, window_bounds = array<i64: 128, 256>}, {transform_indices = @transform_3, window_bounds = array<i64: 128, 128>}, {transform_indices = @transform_4, window_bounds = array<i64: 8, 128>}]} {
    %c0_i32 = arith.constant 0 : i32
    %0 = arith.cmpi eq, %arg1, %c0_i32 : i32
    %1 = arith.extui %0 : i1 to i32
    %c0_i32_0 = arith.constant 0 : i32
    %2 = arith.cmpi ne, %1, %c0_i32_0 : i32
    scf.if %2 {
      %c0_17 = arith.constant 0 : index
      %c0_18 = arith.constant 0 : index
      %31 = vector.load %arg2[%c0_17, %c0_18] : memref<8x128xf32, #tpu.memory_space<vmem>>, vector<8x128xf32>
      %32 = arith.mulf %31, %31 : vector<8x128xf32>
      %cst_19 = arith.constant dense<0.000000e+00> : vector<8xf32>
      %33 = vector.multi_reduction <add>, %32, %cst_19 [1] : vector<8x128xf32> to vector<8xf32>
      %34 = vector.shape_cast %33 : vector<8xf32> to vector<8x1xf32>
      %cst_20 = arith.constant 3.125000e-02 : f32
      %35 = vector.broadcast %cst_20 : f32 to vector<8x1xf32>
      %36 = arith.mulf %34, %35 : vector<8x1xf32>
      %cst_21 = arith.constant 9.99999997E-7 : f32
      %37 = vector.broadcast %cst_21 : f32 to vector<8x1xf32>
      %38 = arith.addf %36, %37 : vector<8x1xf32>
      %39 = math.rsqrt %38 : vector<8x1xf32>
      %40 = vector.broadcast %39 : vector<8x1xf32> to vector<8x128xf32>
      %41 = arith.mulf %31, %40 : vector<8x128xf32>
      %c0_22 = arith.constant 0 : index
      %c0_23 = arith.constant 0 : index
      %42 = vector.load %arg3[%c0_22, %c0_23] : memref<1x128xf32, #tpu.memory_space<vmem>>, vector<1x128xf32>
      %43 = vector.broadcast %42 : vector<1x128xf32> to vector<8x128xf32>
      %44 = arith.mulf %41, %43 : vector<8x128xf32>
      %45 = arith.truncf %44 : vector<8x128xf32> to vector<8x128xbf16>
      %c0_24 = arith.constant 0 : index
      %c0_25 = arith.constant 0 : index
      %46 = vector.load %arg7[%c0_24, %c0_25] : memref<8x128xbf16, #tpu.memory_space<vmem>>, vector<8x128xbf16>
      tpu.vector_store %arg7[%c0_24, %c0_25], %45 {strides = array<i32>} : memref<8x128xbf16, #tpu.memory_space<vmem>>, vector<8x128xbf16>,
      %cst_26 = arith.constant 0.000000e+00 : f32
      %47 = vector.broadcast %cst_26 : f32 to vector<8x128xf32>
      %c0_27 = arith.constant 0 : index
      %c0_28 = arith.constant 0 : index
      %48 = vector.load %arg8[%c0_27, %c0_28] : memref<8x128xf32, #tpu.memory_space<vmem>>, vector<8x128xf32>
      tpu.vector_store %arg8[%c0_27, %c0_28], %47 {strides = array<i32>} : memref<8x128xf32, #tpu.memory_space<vmem>>, vector<8x128xf32>,
    } else {
    }
    %c0 = arith.constant 0 : index
    %c0_1 = arith.constant 0 : index
    %3 = vector.load %arg7[%c0, %c0_1] : memref<8x128xbf16, #tpu.memory_space<vmem>>, vector<8x128xbf16>
    %c0_2 = arith.constant 0 : index
    %c0_3 = arith.constant 0 : index
    %4 = vector.load %arg4[%c0_2, %c0_3] : memref<128x256xbf16, #tpu.memory_space<vmem>>, vector<128x256xbf16>
    %cst = arith.constant dense<0.000000e+00> : vector<8x256xf32>
    %5 = tpu.matmul %3, %4, %cst {dimension_numbers = #tpu.dot_dimension_numbers<[1], [0], [0], [1], [0, 0, 1, 1], [], []>} : vector<8x128xbf16>, vector<128x256xbf16>, vector<8x256xf32> -> vector<8x256xf32>
    %6 = vector.extract_strided_slice %5 {offsets = [0, 0], sizes = [8, 128], strides = [1, 1]} : vector<8x256xf32> to vector<8x128xf32>
    %cst_4 = arith.constant 5.000000e-01 : f32
    %7 = vector.broadcast %cst_4 : f32 to vector<8x128xf32>
    %8 = arith.mulf %7, %6 : vector<8x128xf32>
    %cst_5 = arith.constant 4.471500e-02 : f32
    %9 = vector.broadcast %cst_5 : f32 to vector<8x128xf32>
    %10 = arith.mulf %9, %6 : vector<8x128xf32>
    %11 = arith.mulf %10, %6 : vector<8x128xf32>
    %12 = arith.mulf %11, %6 : vector<8x128xf32>
    %13 = arith.addf %6, %12 : vector<8x128xf32>
    %cst_6 = arith.constant 0.797884583 : f32
    %14 = vector.broadcast %cst_6 : f32 to vector<8x128xf32>
    %15 = arith.mulf %14, %13 : vector<8x128xf32>
    %16 = math.tanh %15 : vector<8x128xf32>
    %cst_7 = arith.constant 1.000000e+00 : f32
    %17 = vector.broadcast %cst_7 : f32 to vector<8x128xf32>
    %18 = arith.addf %17, %16 : vector<8x128xf32>
    %19 = arith.mulf %8, %18 : vector<8x128xf32>
    %20 = vector.extract_strided_slice %5 {offsets = [0, 128], sizes = [8, 128], strides = [1, 1]} : vector<8x256xf32> to vector<8x128xf32>
    %21 = arith.mulf %19, %20 : vector<8x128xf32>
    %c0_8 = arith.constant 0 : index
    %c0_9 = arith.constant 0 : index
    %22 = vector.load %arg8[%c0_8, %c0_9] : memref<8x128xf32, #tpu.memory_space<vmem>>, vector<8x128xf32>
    %23 = arith.truncf %21 : vector<8x128xf32> to vector<8x128xbf16>
    %c0_10 = arith.constant 0 : index
    %c0_11 = arith.constant 0 : index
    %24 = vector.load %arg5[%c0_10, %c0_11] : memref<128x128xbf16, #tpu.memory_space<vmem>>, vector<128x128xbf16>
    %cst_12 = arith.constant dense<0.000000e+00> : vector<8x128xf32>
    %25 = tpu.matmul %23, %24, %cst_12 {dimension_numbers = #tpu.dot_dimension_numbers<[1], [0], [0], [1], [0, 0, 1, 1], [], []>} : vector<8x128xbf16>, vector<128x128xbf16>, vector<8x128xf32> -> vector<8x128xf32>
    %26 = arith.addf %22, %25 : vector<8x128xf32>
    %c0_13 = arith.constant 0 : index
    %c0_14 = arith.constant 0 : index
    %27 = vector.load %arg8[%c0_13, %c0_14] : memref<8x128xf32, #tpu.memory_space<vmem>>, vector<8x128xf32>
    tpu.vector_store %arg8[%c0_13, %c0_14], %26 {strides = array<i32>} : memref<8x128xf32, #tpu.memory_space<vmem>>, vector<8x128xf32>,
    %c0_i32_15 = arith.constant 0 : i32
    %28 = arith.cmpi eq, %arg1, %c0_i32_15 : i32
    %29 = arith.extui %28 : i1 to i32
    %c0_i32_16 = arith.constant 0 : i32
    %30 = arith.cmpi ne, %29, %c0_i32_16 : i32
    scf.if %30 {
      %c0_17 = arith.constant 0 : index
      %c0_18 = arith.constant 0 : index
      %31 = vector.load %arg8[%c0_17, %c0_18] : memref<8x128xf32, #tpu.memory_space<vmem>>, vector<8x128xf32>
      %c0_19 = arith.constant 0 : index
      %c0_20 = arith.constant 0 : index
      %32 = vector.load %arg2[%c0_19, %c0_20] : memref<8x128xf32, #tpu.memory_space<vmem>>, vector<8x128xf32>
      %33 = arith.addf %31, %32 : vector<8x128xf32>
      %c0_21 = arith.constant 0 : index
      %c0_22 = arith.constant 0 : index
      %34 = vector.load %arg6[%c0_21, %c0_22] : memref<8x128xf32, #tpu.memory_space<vmem>>, vector<8x128xf32>
      tpu.vector_store %arg6[%c0_21, %c0_22], %33 {strides = array<i32>} : memref<8x128xf32, #tpu.memory_space<vmem>>, vector<8x128xf32>,
    } else {
    }
    return
  }
  func.func @transform_0(%arg0: i32, %arg1: i32) -> (i32, i32) {
    %c0_i32 = arith.constant 0 : i32
    %c0_i32_0 = arith.constant 0 : i32
    return %arg0, %c0_i32 : i32, i32
  }
  func.func @transform_1(%arg0: i32, %arg1: i32) -> (i32, i32) {
    %c0_i32 = arith.constant 0 : i32
    %c0_i32_0 = arith.constant 0 : i32
    %c0_i32_1 = arith.constant 0 : i32
    return %c0_i32, %c0_i32_0 : i32, i32
  }
  func.func @transform_2(%arg0: i32, %arg1: i32) -> (i32, i32) {
    %c0_i32 = arith.constant 0 : i32
    %c0_i32_0 = arith.constant 0 : i32
    return %c0_i32, %arg1 : i32, i32
  }
  func.func @transform_3(%arg0: i32, %arg1: i32) -> (i32, i32) {
    %c0_i32 = arith.constant 0 : i32
    %c0_i32_0 = arith.constant 0 : i32
    return %arg1, %c0_i32 : i32, i32
  }
  func.func @transform_4(%arg0: i32, %arg1: i32) -> (i32, i32) {
    %c0_i32 = arith.constant 0 : i32
    %c0_i32_0 = arith.constant 0 : i32
    return %arg0, %c0_i32 : i32, i32
  }
}

</mosaic_0001>

<bundles_post_ra>
// kernel: tpu_custom_call.1
= control target key start
LH: loop header
LB: loop body
LE: loop exit
PB: predicated region body
PF: predicated region fallthrough
CT: control target
= control target key end

     0   :  { %9 = vsyncpa [#allocation5], 0  ;;  %s1272_s0 = inlined_call_operand.hbm [shape: f32[16,128], index: 0, kind: input, shape index: {}]   ;;  %s1273_s1 = inlined_call_operand.vmem [shape: f32[1,128], index: 1, kind: input, shape index: {}]   ;;  %s1274_s2 = inlined_call_operand.hbm [shape: bf16[128,256], index: 2, kind: input, shape index: {}]   ;;  %s1275_s3 = inlined_call_operand.hbm [shape: bf16[128,128], index: 3, kind: input, shape index: {}]   ;;  %s1276_s4 = inlined_call_operand.hbm [shape: f32[16,128], index: 4, kind: output, shape index: {}]  }
   0x1   :  { %11 = vsyncpa [#allocation5 + $0x1], 0 }
   0x2   :  { %12 = vsyncpa [#allocation8], 0 }
   0x3   :  { %13 = vsyncpa [#allocation6], 0 }
   0x4   :  { %15 = vsyncpa [#allocation6 + $0x1], 0  ;;  %s1073_s15 = smov 0   ;;  %s1075_s16 = smov 0  }
   0x5   :  { %s1077_s17 = smov 0   ;;  %s1079_s18 = smov 0  }
   0x6   :  { %s1081_s19 = smov 0   ;;  %s1083_s20 = smov 0  }
   0x7 LB: > { %s674_s21 = sadd.s32 4294967295, %s1035_s20   ;;  %s675_s22 = sadd.s32 4294967294, %s1035_s20   ;;  %s1035_s20 = sphi %s1083_s20, %s21_s20   ;;  %s1031_s19 = sphi %s1081_s19, %s1296_s19   ;;  %s1027_s18 = sphi %s1079_s18, %s1295_s18   ;;  %s1023_s17 = sphi %s1077_s17, %s1294_s17   ;;  %s1019_s16 = sphi %s1075_s16, %s1293_s16   ;;  %s1015_s15 = sphi %s1073_s15, %s1292_s15  }
   0x8   : > { %p53_p0 = scmp.ne.s32.totalorder %s1019_s16, %s1015_s15  ;;  %p1107_p1 = scmp.eq.s32.totalorder %s674_s21, 0 }
   0x9   : > { %p1111_p2 = scmp.eq.s32.totalorder %s674_s21, 1  ;;  %p156_p3 = scmp.eq.s32.totalorder %s675_s22, 1 }
   0xa   : > { %s1280_s23 = scalar_select %p1107_p1, 1, 0 }
   0xb   : > { %p1117_p4 = por %p1107_p1, %p53_p0  ;;  %p676_p5 = scmp.ge.s32.totalorder %s1035_s20, 1 }
   0xc   : > { %p1122_p6 = por %p156_p3, %p53_p0  ;;  %p163_p7 = scmp.lt.s32.totalorder %s1035_s20, 3 }
   0xd   : > { %s1282_s25 = scalar_select %p1117_p4, 1, 0 }
   0xe   : > { %s1283_s26 = scalar_select %p1122_p6, 1, 0 }
   0xf   : > { %p1127_p8 = pnand %p676_p5, %p163_p7  ;;  %s1037_s28 = smov [#allocation7]  }
  0x10   : > { %s181_s29 = sshll.u32 %s1037_s28, 4  ;;  %s1038_s5 = smov [#allocation9]   ;;  %s182_s29 = int_to_ptr.vmem [resolvable:$true] %s181_s29 }
  0x11   : > { %p757_p9 = pneg %p1127_p8  ;;  %s197_s6 = sshll.u32 %s1038_s5, 4  ;;  %s198_s6 = int_to_ptr.vmem [resolvable:$true] %s197_s6 }
  0x12   : > { %s882_s7 = scalar_lea.vmem %s182_s29, 2048  ;;  %p890_p5 = scmp.lt.s32.totalorder %s182_s29, %s182_s29 }
  0x13   : > { %p1136_p11 = pnand %p757_p9, %p1107_p1  ;;  %p883_p13 = scmp.ne.s32.totalorder %s182_s29, %s882_s7 }
  0x14   : > { %p891_p7 = scmp.lt.s32.totalorder %s882_s7, %s882_s7 }
  0x15   : > { %p873_p12 = pneg %p1136_p11 }
  0x16   : > { %p892_p10 = por %p891_p7, %p890_p5 }
  0x17   : > { %p885_p0 = pnand %p883_p13, %p873_p12 }
  0x19   : > { %p886_p3 = pneg %p885_p0 }
  0x1b   : > { %p893_p9 = pnand %p892_p10, %p886_p3 }
  0x1d   : > { %896 = shalt.err (!%p893_p9)
}
  0x1e   : > { %s1039_s8 = smov 128   ;;  %s1040_s9 = smov 8  }
  0x1f   : > { %760 = dma.hbm_to_vmem [thread:$0]  (!%p1136_p11), %s1274_s2, 2048, %s182_s29, [#allocation8], %s1039_s8, %s1039_s8, %s1040_s9  }
  0x20   : > { %s908_s12 = scalar_lea.vmem %s198_s6, 1024  ;;  %p916_p1 = scmp.lt.s32.totalorder %s198_s6, %s198_s6 }
  0x21   : > { %p909_p6 = scmp.ne.s32.totalorder %s198_s6, %s908_s12  ;;  %p917_p4 = scmp.lt.s32.totalorder %s908_s12, %s908_s12 }
  0x23   : > { %p911_p13 = pnand %p909_p6, %p873_p12  ;;  %p918_p5 = por %p917_p4, %p916_p1 }
  0x25   : > { %p912_p0 = pneg %p911_p13 }
  0x27   : > { %p919_p10 = pnand %p918_p5, %p912_p0 }
  0x29   : > { %922 = shalt.err (!%p919_p10)
}
  0x2a   : > { %s1041_s13 = smov 64   ;;  %s1042_s14 = smov 4  }
  0x2b   : > { %763 = dma.hbm_to_vmem [thread:$0]  (!%p1136_p11), %s1275_s3, 1024, %s198_s6, [#allocation8], %s1041_s13, %s1041_s13, %s1042_s14  }
  0x2c   : > { %s33_s28 = sadd.s32 1, %s1031_s19  ;;  %s40_s29 = sadd.s32 1, %s1023_s17 }
  0x2d   : > { %p35_p1 = scmp.ge.s32.totalorder %s33_s28, 2  ;;  %p47_p4 = scmp.ne.s32.totalorder %s1023_s17, %s1019_s16 }
  0x2e   : > { %p48_p6 = scmp.eq.s32.totalorder %s1035_s20, 0  ;;  %p774_p12 = scmp.lt.s32.totalorder %s1035_s20, 2 }
  0x2f   : > { %s1298_s28 = smov (%p35_p1, %s33_s28), 0  ;;  %p1168_p7 = por %p1111_p2, %p47_p4 }
  0x30   : > { %p49_p3 = por %p48_p6, %p47_p4  ;;  %s37_s30 = ssub.s32 %s1031_s19, %s1298_s28 }
  0x31   : > { %s211_s7 = sand.u32 1, %s1023_s17   ;;  %p38_p9 = scmp.eq.s32.totalorder %s37_s30, 0 }
  0x32   : > { %s680_s6 = sshll.u32 %s211_s7, 3  ;;  %s681_s8 = sshll.u32 %s1031_s19, 7 }
  0x33   : > { %s1177_s9 = scalar_select %p38_p9, %s1023_s17, %s40_s29  }
  0x34   : > { %s220_s12 = scalar_lea.hbm %s1272_s0, %s681_s8  ;;  %s215_s13 = scalar_lea.vmem [#allocation4], %s680_s6 }
  0x35   : > { %s222_s14 = sshll.u32 %s215_s13, 4  ;;  %p1184_p11 = pnand %p774_p12, %p49_p3  ;;  %s223_s14 = int_to_ptr.vmem [resolvable:$true] %s222_s14 }
  0x36   : > { %s212_s21 = scalar_lea.sflag [#allocation5], %s211_s7  ;;  %s936_s22 = scalar_lea.vmem %s223_s14, 128 }
  0x37   : > { %p925_p2 = pneg %p1184_p11  ;;  %p937_p13 = scmp.ne.s32.totalorder %s223_s14, %s936_s22 }
  0x38   : > { %s1043_s29 = smov [#allocation4]  }
  0x39   : > { %p939_p0 = pnand %p937_p13, %p925_p2  ;;  %s941_s30 = sshll.u32 %s1043_s29, 4  ;;  %s942_s30 = int_to_ptr.vmem [resolvable:$false] %s941_s30 }
  0x3a   : > { %s943_s8 = scalar_lea.vmem %s942_s30, 256  ;;  %p944_p10 = scmp.lt.s32.totalorder %s223_s14, %s942_s30 }
  0x3b   : > { %p940_p5 = pneg %p939_p0  ;;  %p945_p1 = scmp.lt.s32.totalorder %s943_s8, %s936_s22 }
  0x3d   : > { %p946_p4 = por %p945_p1, %p944_p10 }
  0x3f   : > { %p947_p6 = pnand %p946_p4, %p940_p5 }
  0x41   : > { %950 = shalt.err (!%p947_p6)
}
  0x42   : > { %767 = dma.hbm_to_vmem [thread:$0]  (!%p1184_p11), %s220_s12, 128, %s223_s14, %s212_s21  }
  0x43   : > { %231 = sbr.rel (%p1127_p8) target bundleno = 683 (0x2ab), region = 36  ;;  %s1195_s7 = sand.u32 (!%p1127_p8), 1, %s1019_s16  }
  0x44   : > { %s683_s6 = sshll.u32 (!%p1127_p8), %s1195_s7, 3  ;;  %s234_s10 = scalar_lea.sflag (!%p1127_p8), [#allocation5], %s1195_s7 }
  0x45   : > { %s237_s11 = scalar_lea.vmem (!%p1127_p8), [#allocation4], %s683_s6  ;;  %p1288_p12 = scmp.ne.s32.totalorder (!%p1127_p8), %s1282_s25, 0 }
  0x48   : > { %1002 = dma.done.wait (%p1288_p12), %s234_s10, 128  }
  0x49   : > { %1004 = vsyncadd (%p1288_p12), %s234_s10, 4294967168  ;;  %p1289_p3 = scmp.ne.s32.totalorder %s1280_s23, 0 }
  0x4b   : > { %1006 = dma.done.wait (%p1289_p3), [#allocation8], 3072  }
  0x4c   : > { %1008 = vsyncadd (%p1289_p3), [#allocation8], 4294964224  ;;  %v1209_v0 = vld [vmem:[%s237_s11] sm:$0xff]  ;;  %v838_v4 = vld [vmem:[#allocation7 + $0x64] ss:$8 sps:$4 sm:$0xff]   ;;  %v1044_v18 = vmov 0  }
  0x4d   : > { %v278_v1 = vmul.f32 %v1209_v0, %v1209_v0  ;;  %v835_v2 = vld [vmem:[#allocation7 + $0x74] ss:$8 sps:$4 sm:$0xff]   ;;  %v837_v3 = vld [vmem:[#allocation7 + $0x70] ss:$8 sps:$4 sm:$0xff]   ;;  %v840_v5 = vld [vmem:[#allocation7 + $0x60] ss:$8 sps:$4 sm:$0xff]   ;;  %425 = vmatprep.mubr.bf16.mxu0 %v1044_v18 }
  0x4e   : > { %393 = vmatprep.subr.bf16.mxu0 %v835_v2  ;;  %v841_v6 = vld [vmem:[#allocation7 + $0x54] ss:$8 sps:$4 sm:$0xff]   ;;  %v843_v7 = vld [vmem:[#allocation7 + $0x50] ss:$8 sps:$4 sm:$0xff]   ;;  %v844_v8 = vld [vmem:[#allocation7 + $0x44] ss:$8 sps:$4 sm:$0xff]  }
  0x4f   : > { %279 = vadd.xlane.f32.xlu0 %v278_v1  ;;  %394 = vmatpush1.bf16.msra.mxu0 %v837_v3  ;;  %v846_v9 = vld [vmem:[#allocation7 + $0x40] ss:$8 sps:$4 sm:$0xff]   ;;  %v847_v10 = vld [vmem:[#allocation7 + $0x34] ss:$8 sps:$4 sm:$0xff]   ;;  %v849_v11 = vld [vmem:[#allocation7 + $0x30] ss:$8 sps:$4 sm:$0xff]  }
  0x50   : > { %395 = vmatprep.subr.bf16.mxu0 %v838_v4  ;;  %v850_v12 = vld [vmem:[#allocation7 + $0x24] ss:$8 sps:$4 sm:$0xff]   ;;  %v852_v13 = vld [vmem:[#allocation7 + $0x20] ss:$8 sps:$4 sm:$0xff]   ;;  %v853_v14 = vld [vmem:[#allocation7 + $0x14] ss:$8 sps:$4 sm:$0xff]  }
  0x51   : > { %v855_v15 = vld [vmem:[#allocation7 + $0x10] ss:$8 sps:$4 sm:$0xff]   ;;  %v856_v16 = vld [vmem:[#allocation7 + $0x4] ss:$8 sps:$4 sm:$0xff]   ;;  %v858_v17 = vld [vmem:[#allocation7] ss:$8 sps:$4 sm:$0xff]  }
  0x52   : > { %v687_v23 = vld [vmem:[%s1273_s1] ss:$0 sm:$0xff]  ;;  %v859_v28 = vld [vmem:[#allocation9 + $0x38] sm:$0xff]   ;;  %v1045_v29 = vmov 0.0   ;;  %v860_v30 = vld [vmem:[#allocation9 + $0x30] sm:$0xff]   ;;  %vm1046_vm0 = vmmov 0  }
  0x53   : > { %396 = vmatpush1.bf16.msra.mxu0 %v840_v5  ;;  %725 = vmatprep.subr.bf16.mxu1 %v1045_v29  ;;  %v861_v31 = vld [vmem:[#allocation9 + $0x28] sm:$0xff]   ;;  %v862_v32 = vld [vmem:[#allocation9 + $0x20] sm:$0xff]   ;;  %v863_v33 = vld [vmem:[#allocation9 + $0x18] sm:$0xff]   ;;  %s713_s27 = sshll.u32 %s1027_s18, 7  ;;  %s269_s12 = scalar_lea.vmem [#allocation10], %s683_s6 }
  0x54   : > { %397 = vmatprep.subr.bf16.mxu0 %v841_v6  ;;  %726 = vmatpush3.bf16.msra.mxu1 %v859_v28  ;;  %v864_v34 = vld [vmem:[#allocation9 + $0x10] sm:$0xff]   ;;  %v865_v35 = vld [vmem:[#allocation9 + $0x8] sm:$0xff]   ;;  %v866_v36 = vld [vmem:[#allocation9] sm:$0xff]   ;;  %s573_s13 = sshll.u32 %s269_s12, 4  ;;  %s1224_s21 = scalar_lea.hbm %s1276_s4, %s713_s27  ;;  %s1226_s13 = int_to_ptr.vmem [resolvable:$true] %s573_s13 }
  0x55   : > { %727 = vmatprep.subr.bf16.mxu1 %v1045_v29  ;;  %741 = vmatprep.mubr.msk.bf16.mxu1 %vm1046_vm0, %v1045_v29  ;;  %s560_s18 = scalar_lea.sflag [#allocation6], %s1195_s7  ;;  %s951_s22 = scalar_lea.vmem %s1226_s13, 128 }
  0x56   : > { %p952_p8 = scmp.ne.s32.totalorder %s1226_s13, %s951_s22  ;;  %s1047_s29 = smov [#allocation10]  }
  0x57   : > { %398 = vmatpush1.bf16.msra.mxu0 %v843_v7  ;;  %s955_s30 = sshll.u32 %s1047_s29, 4  ;;  %s956_s30 = int_to_ptr.vmem [resolvable:$false] %s955_s30 }
  0x58   : > { %399 = vmatprep.subr.bf16.mxu0 %v844_v8  ;;  %728 = vmatpush3.bf16.msra.mxu1 %v860_v30  ;;  %p953_p9 = pnand %p952_p8, %p1168_p7  ;;  %s957_s8 = scalar_lea.vmem %s956_s30, 256 }
  0x59   : > { %729 = vmatprep.subr.bf16.mxu1 %v1045_v29  ;;  %p958_p2 = scmp.lt.s32.totalorder %s1226_s13, %s956_s30  ;;  %p959_p13 = scmp.lt.s32.totalorder %s957_s8, %s951_s22 }
  0x5a   : > { %p954_p11 = pneg %p953_p9 }
  0x5b   : > { %400 = vmatpush1.bf16.msra.mxu0 %v846_v9  ;;  %p960_p0 = por %p959_p13, %p958_p2 }
  0x5c   : > { %401 = vmatprep.subr.bf16.mxu0 %v847_v10  ;;  %730 = vmatpush3.bf16.msra.mxu1 %v861_v31 }
  0x5d   : > { %731 = vmatprep.subr.bf16.mxu1 %v1045_v29  ;;  %p961_p5 = pnand %p960_p0, %p954_p11 }
  0x5f   : > { %402 = vmatpush1.bf16.msra.mxu0 %v849_v11 }
  0x60   : > { %403 = vmatprep.subr.bf16.mxu0 %v850_v12  ;;  %732 = vmatpush3.bf16.msra.mxu1 %v862_v32 }
  0x61   : > { %733 = vmatprep.subr.bf16.mxu1 %v1045_v29 }
  0x63   : > { %404 = vmatpush1.bf16.msra.mxu0 %v852_v13 }
  0x64   : > { %405 = vmatprep.subr.bf16.mxu0 %v853_v14  ;;  %734 = vmatpush3.bf16.msra.mxu1 %v863_v33 }
  0x65   : > { %735 = vmatprep.subr.bf16.mxu1 %v1045_v29 }
  0x67   : > { %406 = vmatpush1.bf16.msra.mxu0 %v855_v15 }
  0x68   : > { %407 = vmatprep.subr.bf16.mxu0 %v856_v16  ;;  %736 = vmatpush3.bf16.msra.mxu1 %v864_v34 }
  0x69   : > { %737 = vmatprep.subr.bf16.mxu1 %v1045_v29 }
  0x6b   : > { %408 = vmatpush1.bf16.msra.mxu0 %v858_v17 }
  0x6c   : > { %738 = vmatpush3.bf16.msra.mxu1 %v865_v35 }
  0x6d   : > { %739 = vmatprep.subr.bf16.mxu1 %v1045_v29 }
  0x70   : > { %740 = vmatpush3.bf16.msra.mxu1 %v866_v36 }
  0xd8   : > { %v280_v19 = vpop.xlane.xlu0 %279 }
  0xd9   : > { %v281_v20 = vmul.f32 0.03125, %v280_v19 }
  0xdb   : > { %v282_v21 = vadd.f32 1e-06, %v281_v20 }
  0xdd   : > { %867 = vrsqrt.f32 %v282_v21 }
  0xea   : > { %v868_v22 = vpop.eup %867 }
  0xeb   : > { %v284_v24 = vmul.f32 %v868_v22, %v1209_v0 }
  0xed   : > { %v292_v25 = vmul.f32 %v687_v23, %v284_v24 }
  0xef   : > { %v293_v26 = vpack.c.bf16 %v292_v25, %v292_v25 }
  0xf1   : > { %294 = vst [vmem:[#allocation2] sm:$0xf] %v293_v26 }
  0xf8   : > { %v296_v27 = vld [vmem:[#allocation2] sm:$0xf] }
  0xf9   : > { %426 = vmatmul.mubr.bf16.vlgmr.msra.gmra.mxu0 %v296_v27 }
 0x1b9   : > { %v427_v37 = vpop.f32.mrf.mxu0 }
 0x1ba   : > { %v435_v38 = vmul.f32 0.044715, %v427_v37  ;;  %v434_v47 = vmul.f32 0.5, %v427_v37 }
 0x1bb   : > { %v429_v39 = vpop.f32.mrf.mxu0 }
 0x1bc   : > { %v436_v40 = vmul.f32 %v435_v38, %v427_v37 }
 0x1bd   : > { %v431_v41 = vpop.f32.mrf.mxu0 }
 0x1be   : > { %v437_v42 = vmul.f32 %v436_v40, %v427_v37 }
 0x1bf   : > { %v432_v43 = vpop.f32.mrf.mxu0 }
 0x1c0   : > { %v438_v44 = vadd.f32 %v437_v42, %v427_v37 }
 0x1c2   : > { %v439_v45 = vmul.f32 0.7978846, %v438_v44 }
 0x1c4   : > { %869 = vtanh.f32 %v439_v45 }
 0x1d1   : > { %v870_v46 = vpop.eup %869 }
 0x1d2   : > { %v441_v48 = vadd.f32 1.0, %v870_v46 }
 0x1d4   : > { %v442_v49 = vmul.f32 %v441_v48, %v434_v47 }
 0x1d6   : > { %v443_v50 = vmul.f32 %v442_v49, %v429_v39 }
 0x1d8   : > { %v445_v51 = vpack.c.bf16 %v443_v50, %v443_v50 }
 0x1da   : > { %742 = vmatmul.mubr.bf16.vlgmr.msra.gmra.mxu1 %v445_v51 }
 0x29a   : > { %v544_v52 = vpop.f32.mrf.mxu1 }
 0x29b   : > { %v557_v53 = vadd.f32 %v544_v52, %v1209_v0 }
 0x29c   : > { %v743_v54 = vpop.f32.mrf.mxu1 }
 0x29d   : > { %558 = vst [vmem:[%s269_s12] sm:$0xff] %v557_v53 }
 0x29e   : > { %v547_v55 = vpop.f32.mrf.mxu1 }
 0x29f   : > { %964 = shalt.err (!%p961_p5)
}
 0x2a0   : > { %s965_s6 = scalar_lea.hbm %s1224_s21, 128  ;;  %s969_s11 = scalar_lea.hbm %s1276_s4, 256 }
 0x2a1   : > { %p966_p10 = scmp.ne.s32.totalorder %s1224_s21, %s965_s6  ;;  %p970_p6 = scmp.lt.s32.totalorder %s1224_s21, %s1276_s4 }
 0x2a2   : > { %p971_p12 = scmp.lt.s32.totalorder %s969_s11, %s965_s6 }
 0x2a3   : > { %p967_p1 = pnand %p966_p10, %p1168_p7 }
 0x2a4   : > { %p972_p3 = por %p971_p12, %p970_p6 }
 0x2a5   : > { %p968_p4 = pneg %p967_p1 }
 0x2a7   : > { %p973_p8 = pnand %p972_p3, %p968_p4 }
 0x2a9   : > { %976 = shalt.err (!%p973_p8)
}
 0x2aa   : > { %755 = dma.vmem_to_hbm [thread:$0]  (%p1168_p7), %s1226_s13, 128, %s1224_s21, %s560_s18   ;;  %v744_v56 = vpop.f32.mrf.mxu1 }
 0x2ab PF: > { %s585_s27 = sand.u32 1, %s1015_s15   ;;  %p1290_p9 = scmp.ne.s32.totalorder %s1283_s26, 0 }
 0x2ac   : > { %p1291_p11 = scmp.ge.s32.totalorder %s1035_s20, 2  ;;  %s586_s12 = scalar_lea.sflag [#allocation6], %s585_s27 }
 0x2ae   : > { %p769_p2 = pnand %p1291_p11, %p1290_p9 }
 0x2b0   : > { %p770_p13 = pneg %p769_p2 }
 0x2b2   : > { %1010 = dma.done.wait (%p770_p13), %s586_s12, 128  }
 0x2b3   : > { %1012 = vsyncadd (%p770_p13), %s586_s12, 4294967168  ;;  %s21_s20 = sadd.s32 1, %s1035_s20   ;;  %s1292_s15 = smov %s1019_s16 }
 0x2b4   : > { %p18_p0 = scmp.ge.s32.totalorder %s21_s20, 4   ;;  %s1293_s16 = smov %s1023_s17 }
 0x2b5   : > { %s1294_s17 = smov %s1177_s9  ;;  %s1295_s18 = smov %s1031_s19 }
 0x2b6   : > { %s1296_s19 = smov %s1298_s28  ;;  %20 = sbr.rel (!%p18_p0) target bundleno = 7 (0x7), region = 99 }
 0x2bb   :  { %591 = vsyncpa [#allocation5], 1 }
 0x2bc   :  { %593 = vsyncpa [#allocation5 + $0x1], 1 }
 0x2bd   :  { %594 = vsyncpa [#allocation8], 1 }
 0x2be   :  { %595 = vsyncpa [#allocation6], 1 }
 0x2bf   :  { %597 = vsyncpa [#allocation6 + $0x1], 1 }

</bundles_post_ra>
